<compile_context>
chip_gen: v7x
topology: tpu7x:2x2x1
jax: 0.10.0
libtpu: 0.0.40
codegen_flags: <defaults>
</compile_context>

<pallas_src>
import functools

import jax
import jax.numpy as jnp
from jax.experimental import pallas as pl
from jax.experimental.pallas import tpu as pltpu

LANES = 128


def _round_up(x, m):
    return -(-x // m) * m


def _vmem_capacity_bytes():
    """Generation-aware VMEM capacity (64 MiB on v7x, 128 MiB on v5e/v6e)."""
    try:
        return int(pltpu.get_tpu_info().vmem_capacity_bytes)
    except Exception:
        return 64 << 20          # conservative (v7x per-TensorCore) fallback


def _layernorm(v, gamma, beta, eps=1e-5):
    mu = jnp.mean(v, axis=-1, keepdims=True)
    d = v - mu
    var = jnp.mean(d * d, axis=-1, keepdims=True)
    return d * jax.lax.rsqrt(var + eps) * gamma + beta


# ---------------------------------------------------------------------------
# Pallas kernel: fused TextCNN + LayerNorm + FC head
# ---------------------------------------------------------------------------
def textbertcnn_kernel(
    x_ref,        # (bt*seq, E)  activation tile (bf16 ideally; cast in-VMEM)
    w_ref,        # (rows, 128)  bf16  packed [W_conv_by_tap | W_fc1 | W_fc2]
    p_ref,        # (8, 128)     f32   packed conv biases / LN params / FC biases
    out_ref,      # (bt, 128)    f32   lane-dense logits slab
    *, bt, seq, valid_len, num_filters, kernel_sizes, fc_hidden, w_offsets,
):
    nfil = num_filters
    nks = len(kernel_sizes)
    nf3 = nks * nfil
    max_ks = max(kernel_sizes)
    e = x_ref.shape[1]
    n_rows = bt * seq
    off_fc1, off_fc2 = w_offsets

    # ---- all conv taps in ONE MXU matmul (bf16 in, f32 accumulate) ----------
    x = x_ref[...].astype(jnp.bfloat16)               # in-VMEM cast if f32
    w_conv = w_ref[0:e, :]                             # (e, 128) bf16
    y = jnp.dot(x, w_conv, preferred_element_type=jnp.float32)  # (bt*seq, 128)

    # ---- conv = shift-and-add over tap groups (lanes grouped by tap k) ------
    # Group k owns lanes [k*nf3, (k+1)*nf3); convs with no tap at offset k have
    # zero weight columns there, so summing the full group is exact.  The time
    # shift is a sublane roll of the flattened (bt*seq) axis; wrapped /
    # cross-batch rows only ever land on positions masked invalid below
    # (t + k stays inside the sequence for every valid t since k < ks).
    acc = y[:, 0:nf3]
    for k in range(1, max_ks):
        yk = pltpu.roll(y, n_rows - k, axis=0)         # row r <- row (r+k) mod N
        acc = acc + yk[:, k * nf3:(k + 1) * nf3]
    acc = acc.reshape(bt, seq, nf3)                    # (bt, seq, nf3) f32

    # ---- full-seq max-pool over time with a static -inf validity mask -------
    # valid t for the conv with kernel size ks:  t < valid_len - ks + 1
    t_idx = jax.lax.broadcasted_iota(jnp.int32, (seq, nf3), 0)
    f_idx = jax.lax.broadcasted_iota(jnp.int32, (seq, nf3), 1)
    limit = jnp.full((seq, nf3), valid_len - kernel_sizes[0] + 1, jnp.int32)
    for j in range(1, nks):
        limit = jnp.where(f_idx >= j * nfil,
                          valid_len - kernel_sizes[j] + 1, limit)
    acc = jnp.where((t_idx < limit)[None, :, :], acc, -jnp.inf)
    feat = jnp.max(acc, axis=1)                        # (bt, nf3) f32

    # ---- small params (single packed slab, one load) -------------------------
    p = p_ref[...]                                     # (8, 128) f32
    conv_b = p[0:1, 0:nf3]
    ln1_g, ln1_b = p[1:2, 0:nf3], p[2:3, 0:nf3]
    fc1_b = p[3:4, :]                                  # (1, 128) zero-padded
    ln2_g, ln2_b = p[4:5, 0:fc_hidden], p[5:6, 0:fc_hidden]
    fc2_b = p[6:7, :]                                  # (1, 128) zero-padded

    # bias + ReLU deferred past the max-pool: valid because ReLU is monotone
    # and the conv bias is time-invariant -> relu(max_t c_t + b) == max_t relu(c_t + b)
    feat = jnp.maximum(feat + conv_b, 0.0)
    h = _layernorm(feat, ln1_g, ln1_b)                 # (bt, nf3) f32

    # ---- fc_hidden + LayerNorm ------------------------------------------------
    w_fc1 = w_ref[off_fc1:off_fc1 + nf3, :]            # 16-aligned start row
    h = jnp.dot(h.astype(jnp.bfloat16), w_fc1,
                preferred_element_type=jnp.float32) + fc1_b     # (bt, 128)
    h = _layernorm(h[:, 0:fc_hidden], ln2_g, ln2_b)    # (bt, H) f32

    # ---- final fc -> lane-dense (bt, 128) store -------------------------------
    w_fc2 = w_ref[off_fc2:off_fc2 + fc_hidden, :]      # 16-aligned start row
    out = jnp.dot(h.astype(jnp.bfloat16), w_fc2,
                  preferred_element_type=jnp.float32) + fc2_b   # (bt, 128)
    out_ref[...] = out.astype(out_ref.dtype)


# ---------------------------------------------------------------------------
# Wrapper: packs params into two slabs, picks a generation-aware batch tile,
# calls pallas_call with a (parallel) batch grid, slices the lane-dense output.
# ---------------------------------------------------------------------------
def textbertcnn_forward(embedded, params, *, kernel_sizes, num_filters,
                        fc_hidden, label_size, batch_tile=None):
    """embedded: (B, S, E) bf16 or f32 (the BERT last_hidden_state)."""
    B, S, E = embedded.shape
    nfil = num_filters
    nks = len(kernel_sizes)
    nf3 = nks * nfil
    max_ks = max(kernel_sizes)
    assert S >= max_ks
    # single-128-lane packing: by-k tap groups and every head dim fit one vreg span
    assert max_ks * nf3 <= LANES
    assert nf3 <= LANES and fc_hidden <= LANES and label_size <= LANES

    # -- pad the sequence to an 8-aligned sublane extent (zeros), if needed -----
    s_pad = _round_up(S, 8)
    x = embedded
    if s_pad != S:
        x = jnp.pad(x, ((0, 0), (0, s_pad - S), (0, 0)))

    # -- generation-aware batch tile from a VMEM budget -------------------------
    act_bytes = jnp.dtype(x.dtype).itemsize
    vmem_cap = _vmem_capacity_bytes()
    if batch_tile is None:
        # per batch row: double-buffered activation tile + f32 y (+ roll temps)
        per_row = 2 * s_pad * E * act_bytes + 3 * s_pad * LANES * 4 + 4 * LANES * 4
        bt_cap = max(8, int((vmem_cap * 7 // 10) // per_row) // 8 * 8)
        bt_cap = min(bt_cap, 512)
    else:
        bt_cap = max(8, _round_up(batch_tile, 8))
    b8 = _round_up(B, 8)
    bt = min(bt_cap, b8)
    if b8 >= 16:                      # >=2 grid steps so v7x's 2nd TC gets work
        bt = min(bt, _round_up(-(-b8 // 2), 8))
    if bt >= b8:
        bt, b_pad = B, B              # single step: full-dim blocks, no batch pad
    else:
        b_pad = _round_up(B, bt)
        if b_pad != B:
            x = jnp.pad(x, ((0, b_pad - B), (0, 0), (0, 0)))
    # No standalone cast pass: kernel consumes the activation in its native
    # dtype (bf16 straight from the encoder ideally) and casts in-VMEM.
    x = x.reshape(b_pad * s_pad, E)

    # -- pack the three matmul weights into one lane-padded bf16 slab -----------
    off_fc1 = _round_up(E, 16)                  # 16-row aligned (bf16 sublane pack)
    off_fc2 = off_fc1 + _round_up(nf3, 16)
    rows = _round_up(off_fc2 + _round_up(fc_hidden, 16), 16)
    w_slab = jnp.zeros((rows, LANES), jnp.float32)
    # conv taps grouped BY TAP OFFSET k: group k owns lanes [k*nf3,(k+1)*nf3);
    # within a group conv j sits at lanes [k*nf3 + j*F, ...); convs with no tap
    # at offset k stay zero (contribute nothing to the in-kernel shift-add).
    for j, ks in enumerate(kernel_sizes):
        w = params[f"w{ks}"]                    # (ks, E, F)
        for k in range(ks):
            col = k * nf3 + j * nfil
            w_slab = w_slab.at[0:E, col:col + nfil].set(w[k])
    w_slab = w_slab.at[off_fc1:off_fc1 + nf3, 0:fc_hidden].set(params["wfc1"])
    w_slab = w_slab.at[off_fc2:off_fc2 + fc_hidden, 0:label_size].set(params["wfc2"])
    w_slab = w_slab.astype(jnp.bfloat16)

    # -- pack every small vector into a single (8, 128) f32 slab ----------------
    p_slab = jnp.zeros((8, LANES), jnp.float32)
    conv_b = jnp.concatenate([params[f"b{ks}"].reshape(-1) for ks in kernel_sizes])
    p_slab = p_slab.at[0, 0:nf3].set(conv_b)
    p_slab = p_slab.at[1, 0:nf3].set(params["ln1_g"].reshape(-1))
    p_slab = p_slab.at[2, 0:nf3].set(params["ln1_b"].reshape(-1))
    p_slab = p_slab.at[3, 0:fc_hidden].set(params["bfc1"].reshape(-1))
    p_slab = p_slab.at[4, 0:fc_hidden].set(params["ln2_g"].reshape(-1))
    p_slab = p_slab.at[5, 0:fc_hidden].set(params["ln2_b"].reshape(-1))
    p_slab = p_slab.at[6, 0:label_size].set(params["bfc2"].reshape(-1))

    # -- explicit VMEM limit from the same budget (with slack for temps) --------
    est = (2 * bt * s_pad * E * act_bytes          # double-buffered activation
           + 3 * bt * s_pad * LANES * 4            # f32 y + roll/mask temps
           + 2 * rows * LANES * 2 + 2 * 8 * LANES * 4
           + 4 * bt * LANES * 4
           + (4 << 20))
    vmem_limit = int(min(max(est, 32 << 20), vmem_cap * 9 // 10))

    kern = functools.partial(
        textbertcnn_kernel, bt=bt, seq=s_pad, valid_len=S, num_filters=nfil,
        kernel_sizes=tuple(kernel_sizes), fc_hidden=fc_hidden,
        w_offsets=(off_fc1, off_fc2))

    out = pl.pallas_call(
        kern,
        out_shape=jax.ShapeDtypeStruct((b_pad, LANES), jnp.float32),
        grid=(b_pad // bt,),
        in_specs=[
            pl.BlockSpec((bt * s_pad, E), lambda i: (i, 0)),    # streaming tile
            # NOTE: constant index maps below; on VMEM-tight configs (v7x with
            # E=768) add pipeline_mode=pl.Buffered(1) to drop the 2nd buffer.
            pl.BlockSpec((rows, LANES), lambda i: (0, 0)),      # weights (resident)
            pl.BlockSpec((8, LANES), lambda i: (0, 0)),         # small params
        ],
        out_specs=pl.BlockSpec((bt, LANES), lambda i: (i, 0)),  # lane-dense logits
        compiler_params=pltpu.CompilerParams(
            dimension_semantics=("parallel",),                  # shard batch on v7x
            vmem_limit_bytes=vmem_limit),
    )(x, w_slab, p_slab)
    return out[:B, :label_size]


# ---------------------------------------------------------------------------
# Deterministic parameter construction (mirrors module __init__ shapes)
# ---------------------------------------------------------------------------
def make_params(key, emb_dim, num_filters, kernel_sizes, fc_hidden, label_size):
    keys = jax.random.split(key, 16)
    p = {}
    # Conv1d weights: PyTorch shape (out_ch=F, in_ch=E, ks); stored as (ks, E, F)
    for i, ks in enumerate(kernel_sizes):
        w = jax.random.normal(keys[i], (ks, emb_dim, num_filters), jnp.float32) * 0.05
        b = jax.random.normal(keys[3 + i], (1, num_filters), jnp.float32) * 0.05
        p[f"w{ks}"] = w
        p[f"b{ks}"] = b
    last_dim = len(kernel_sizes) * num_filters
    p["ln1_g"] = jnp.ones((1, last_dim), jnp.float32)
    p["ln1_b"] = jnp.zeros((1, last_dim), jnp.float32)
    p["wfc1"] = jax.random.normal(keys[6], (last_dim, fc_hidden), jnp.float32) * 0.05
    p["bfc1"] = jax.random.normal(keys[7], (1, fc_hidden), jnp.float32) * 0.05
    p["ln2_g"] = jnp.ones((1, fc_hidden), jnp.float32)
    p["ln2_b"] = jnp.zeros((1, fc_hidden), jnp.float32)
    p["wfc2"] = jax.random.normal(keys[8], (fc_hidden, label_size), jnp.float32) * 0.05
    p["bfc2"] = jax.random.normal(keys[9], (1, label_size), jnp.float32) * 0.05
    return p


# ---------------------------------------------------------------------------
# Pure-JAX reference (f32) for a sanity check against the bf16 MXU kernel
# ---------------------------------------------------------------------------
def reference_forward(embedded, params, kernel_sizes):
    x = embedded.astype(jnp.float32)
    pooled = []
    for ks in kernel_sizes:
        w, b = params[f"w{ks}"], params[f"b{ks}"]
        T = x.shape[1] - ks + 1
        acc = sum(jnp.einsum("bte,ef->btf", x[:, k:k + T, :], w[k]) for k in range(ks))
        acc = jax.nn.relu(acc + b)
        pooled.append(jnp.max(acc, axis=1))
    feat = jnp.concatenate(pooled, axis=1)

    def ln(v, g, b, eps=1e-5):
        mu = v.mean(-1, keepdims=True)
        var = ((v - mu) ** 2).mean(-1, keepdims=True)
        return (v - mu) * jax.lax.rsqrt(var + eps) * g + b

    h = ln(feat, params["ln1_g"], params["ln1_b"])
    h = h @ params["wfc1"] + params["bfc1"]
    h = ln(h, params["ln2_g"], params["ln2_b"])
    return h @ params["wfc2"] + params["bfc2"]


if __name__ == "__main__":
    # Small config consistent with the module:
    #   n_ctx (seq) = 16, bert hidden = 32, num_filters = 8,
    #   kernel_sizes = (2, 3, 4), fc_hidden_size = 16, label_size = 4
    B, S, E = 2, 16, 32
    num_filters, kernel_sizes = 8, (2, 3, 4)
    fc_hidden, label_size = 16, 4
    vocab = 100

    key = jax.random.PRNGKey(0)
    k_emb, k_ids, k_par = jax.random.split(key, 3)

    # Synthetic deterministic "BERT": bf16 embedding lookup standing in for
    # bert_model(...).last_hidden_state (plain-JAX glue).  Emitted in bf16 so
    # the wrapper never needs a standalone pad/cast pass over the activation.
    emb_table = (jax.random.normal(k_emb, (vocab, E), jnp.float32) * 0.1
                 ).astype(jnp.bfloat16)
    input_ids = jax.random.randint(k_ids, (B, S), 0, vocab)
    embedded = emb_table[input_ids]                     # (B, S, E) bf16

    params = make_params(k_par, E, num_filters, kernel_sizes, fc_hidden, label_size)

    logits = textbertcnn_forward(
        embedded, params, kernel_sizes=kernel_sizes, num_filters=num_filters,
        fc_hidden=fc_hidden, label_size=label_size)
    logits = jax.block_until_ready(logits)

    assert logits.shape == (B, label_size)
    assert bool(jnp.all(jnp.isfinite(logits)))

    ref = reference_forward(embedded, params, kernel_sizes)
    assert bool(jnp.allclose(logits, ref, atol=8e-2, rtol=1e-1)), (
        f"max abs diff {float(jnp.max(jnp.abs(logits - ref)))}")

    print("KERNEL_OK")
</pallas_src>

<mosaic_0001>
module attributes {stable_mosaic.version = 11 : i64} {
  func.func @textbertcnn_kernel(%arg0: i32, %arg1: memref<32x32xbf16, #tpu.memory_space<vmem>>, %arg2: memref<80x128xbf16, #tpu.memory_space<vmem>>, %arg3: memref<8x128xf32, #tpu.memory_space<vmem>>, %arg4: memref<2x128xf32, #tpu.memory_space<vmem>>) attributes {dimension_semantics = [#tpu.dimension_semantics<parallel>], iteration_bounds = array<i64: 1>, scalar_prefetch = 0 : i64, scratch_operands = 0 : i64, tpu.core_type = #tpu.core_type<tc>, window_params = [{transform_indices = @transform_0, window_bounds = array<i64: 32, 32>}, {pipeline_mode = #tpu.pipeline_mode<synchronous>, transform_indices = @transform_1, window_bounds = array<i64: 80, 128>}, {pipeline_mode = #tpu.pipeline_mode<synchronous>, transform_indices = @transform_2, window_bounds = array<i64: 8, 128>}, {transform_indices = @transform_3, window_bounds = array<i64: 2, 128>}]} {
    %c0 = arith.constant 0 : index
    %c0_0 = arith.constant 0 : index
    %0 = vector.load %arg1[%c0, %c0_0] : memref<32x32xbf16, #tpu.memory_space<vmem>>, vector<32x32xbf16>
    %c0_1 = arith.constant 0 : index
    %c0_2 = arith.constant 0 : index
    %1 = vector.load %arg2[%c0_1, %c0_2] : memref<80x128xbf16, #tpu.memory_space<vmem>>, vector<32x128xbf16>
    %cst = arith.constant dense<0.000000e+00> : vector<32x128xf32>
    %2 = tpu.matmul %0, %1, %cst {dimension_numbers = #tpu.dot_dimension_numbers<[1], [0], [0], [1], [0, 0, 1, 1], [], []>} : vector<32x32xbf16>, vector<32x128xbf16>, vector<32x128xf32> -> vector<32x128xf32>
    %3 = vector.extract_strided_slice %2 {offsets = [0, 0], sizes = [32, 24], strides = [1, 1]} : vector<32x128xf32> to vector<32x24xf32>
    %c31_i32 = arith.constant 31 : i32
    %4 = tpu.dynamic_rotate %2 by %c31_i32 dim 0 : vector<32x128xf32>, i32 -> vector<32x128xf32>
    %5 = vector.extract_strided_slice %4 {offsets = [0, 24], sizes = [32, 24], strides = [1, 1]} : vector<32x128xf32> to vector<32x24xf32>
    %6 = arith.addf %3, %5 : vector<32x24xf32>
    %c30_i32 = arith.constant 30 : i32
    %7 = tpu.dynamic_rotate %2 by %c30_i32 dim 0 : vector<32x128xf32>, i32 -> vector<32x128xf32>
    %8 = vector.extract_strided_slice %7 {offsets = [0, 48], sizes = [32, 24], strides = [1, 1]} : vector<32x128xf32> to vector<32x24xf32>
    %9 = arith.addf %6, %8 : vector<32x24xf32>
    %c29_i32 = arith.constant 29 : i32
    %10 = tpu.dynamic_rotate %2 by %c29_i32 dim 0 : vector<32x128xf32>, i32 -> vector<32x128xf32>
    %11 = vector.extract_strided_slice %10 {offsets = [0, 72], sizes = [32, 24], strides = [1, 1]} : vector<32x128xf32> to vector<32x24xf32>
    %12 = arith.addf %9, %11 : vector<32x24xf32>
    %13 = vector.shape_cast %12 : vector<32x24xf32> to vector<2x16x24xf32>
    %14 = tpu.iota {dimensions = array<i32: 0>} : vector<16x24xi32>
    %15 = tpu.iota {dimensions = array<i32: 1>} : vector<16x24xi32>
    %c15_i32 = arith.constant 15 : i32
    %16 = vector.broadcast %c15_i32 : i32 to vector<16x24xi32>
    %c8_i32 = arith.constant 8 : i32
    %17 = vector.broadcast %c8_i32 : i32 to vector<16x24xi32>
    %18 = arith.cmpi sge, %15, %17 : vector<16x24xi32>
    %c14_i32 = arith.constant 14 : i32
    %19 = vector.broadcast %c14_i32 : i32 to vector<16x24xi32>
    %20 = arith.select %18, %19, %16 : vector<16x24xi1>, vector<16x24xi32>
    %c16_i32 = arith.constant 16 : i32
    %21 = vector.broadcast %c16_i32 : i32 to vector<16x24xi32>
    %22 = arith.cmpi sge, %15, %21 : vector<16x24xi32>
    %c13_i32 = arith.constant 13 : i32
    %23 = vector.broadcast %c13_i32 : i32 to vector<16x24xi32>
    %24 = arith.select %22, %23, %20 : vector<16x24xi1>, vector<16x24xi32>
    %25 = arith.cmpi slt, %14, %24 : vector<16x24xi32>
    %26 = vector.shape_cast %25 : vector<16x24xi1> to vector<1x16x24xi1>
    %cst_3 = arith.constant 0xFF800000 : f32
    %27 = vector.shape_cast %26 : vector<1x16x24xi1> to vector<1x16x24xi1>
    %28 = vector.broadcast %27 : vector<1x16x24xi1> to vector<2x16x24xi1>
    %29 = vector.broadcast %cst_3 : f32 to vector<2x16x24xf32>
    %30 = arith.select %28, %13, %29 : vector<2x16x24xi1>, vector<2x16x24xf32>
    %cst_4 = arith.constant dense<0xFF800000> : vector<2x24xf32>
    %31 = vector.multi_reduction <maximumf>, %30, %cst_4 [1] : vector<2x16x24xf32> to vector<2x24xf32>
    %c0_5 = arith.constant 0 : index
    %c0_6 = arith.constant 0 : index
    %32 = vector.load %arg3[%c0_5, %c0_6] : memref<8x128xf32, #tpu.memory_space<vmem>>, vector<8x128xf32>
    %33 = vector.extract_strided_slice %32 {offsets = [0, 0], sizes = [1, 24], strides = [1, 1]} : vector<8x128xf32> to vector<1x24xf32>
    %34 = vector.extract_strided_slice %32 {offsets = [1, 0], sizes = [1, 24], strides = [1, 1]} : vector<8x128xf32> to vector<1x24xf32>
    %35 = vector.extract_strided_slice %32 {offsets = [2, 0], sizes = [1, 24], strides = [1, 1]} : vector<8x128xf32> to vector<1x24xf32>
    %36 = vector.extract_strided_slice %32 {offsets = [3, 0], sizes = [1, 128], strides = [1, 1]} : vector<8x128xf32> to vector<1x128xf32>
    %37 = vector.extract_strided_slice %32 {offsets = [4, 0], sizes = [1, 16], strides = [1, 1]} : vector<8x128xf32> to vector<1x16xf32>
    %38 = vector.extract_strided_slice %32 {offsets = [5, 0], sizes = [1, 16], strides = [1, 1]} : vector<8x128xf32> to vector<1x16xf32>
    %39 = vector.extract_strided_slice %32 {offsets = [6, 0], sizes = [1, 128], strides = [1, 1]} : vector<8x128xf32> to vector<1x128xf32>
    %40 = vector.broadcast %33 : vector<1x24xf32> to vector<2x24xf32>
    %41 = arith.addf %31, %40 : vector<2x24xf32>
    %cst_7 = arith.constant 0.000000e+00 : f32
    %42 = vector.broadcast %cst_7 : f32 to vector<2x24xf32>
    %43 = arith.maximumf %41, %42 : vector<2x24xf32>
    %cst_8 = arith.constant dense<0.000000e+00> : vector<2xf32>
    %44 = vector.multi_reduction <add>, %43, %cst_8 [1] : vector<2x24xf32> to vector<2xf32>
    %45 = vector.shape_cast %44 : vector<2xf32> to vector<2x1xf32>
    %cst_9 = arith.constant 2.400000e+01 : f32
    %46 = vector.broadcast %cst_9 : f32 to vector<2x1xf32>
    %47 = arith.divf %45, %46 : vector<2x1xf32>
    %48 = vector.broadcast %47 : vector<2x1xf32> to vector<2x24xf32>
    %49 = arith.subf %43, %48 : vector<2x24xf32>
    %50 = arith.mulf %49, %49 : vector<2x24xf32>
    %cst_10 = arith.constant dense<0.000000e+00> : vector<2xf32>
    %51 = vector.multi_reduction <add>, %50, %cst_10 [1] : vector<2x24xf32> to vector<2xf32>
    %52 = vector.shape_cast %51 : vector<2xf32> to vector<2x1xf32>
    %cst_11 = arith.constant 2.400000e+01 : f32
    %53 = vector.broadcast %cst_11 : f32 to vector<2x1xf32>
    %54 = arith.divf %52, %53 : vector<2x1xf32>
    %cst_12 = arith.constant 9.99999974E-6 : f32
    %55 = vector.broadcast %cst_12 : f32 to vector<2x1xf32>
    %56 = arith.addf %54, %55 : vector<2x1xf32>
    %57 = math.rsqrt %56 : vector<2x1xf32>
    %58 = vector.broadcast %57 : vector<2x1xf32> to vector<2x24xf32>
    %59 = arith.mulf %49, %58 : vector<2x24xf32>
    %60 = vector.broadcast %34 : vector<1x24xf32> to vector<2x24xf32>
    %61 = arith.mulf %59, %60 : vector<2x24xf32>
    %62 = vector.broadcast %35 : vector<1x24xf32> to vector<2x24xf32>
    %63 = arith.addf %61, %62 : vector<2x24xf32>
    %c32 = arith.constant 32 : index
    %c0_13 = arith.constant 0 : index
    %64 = vector.load %arg2[%c32, %c0_13] : memref<80x128xbf16, #tpu.memory_space<vmem>>, vector<24x128xbf16>
    %65 = arith.truncf %63 : vector<2x24xf32> to vector<2x24xbf16>
    %cst_14 = arith.constant dense<0.000000e+00> : vector<2x128xf32>
    %66 = tpu.matmul %65, %64, %cst_14 {dimension_numbers = #tpu.dot_dimension_numbers<[1], [0], [0], [1], [0, 0, 1, 1], [], []>} : vector<2x24xbf16>, vector<24x128xbf16>, vector<2x128xf32> -> vector<2x128xf32>
    %67 = vector.broadcast %36 : vector<1x128xf32> to vector<2x128xf32>
    %68 = arith.addf %66, %67 : vector<2x128xf32>
    %69 = vector.extract_strided_slice %68 {offsets = [0, 0], sizes = [2, 16], strides = [1, 1]} : vector<2x128xf32> to vector<2x16xf32>
    %cst_15 = arith.constant dense<0.000000e+00> : vector<2xf32>
    %70 = vector.multi_reduction <add>, %69, %cst_15 [1] : vector<2x16xf32> to vector<2xf32>
    %71 = vector.shape_cast %70 : vector<2xf32> to vector<2x1xf32>
    %cst_16 = arith.constant 1.600000e+01 : f32
    %72 = vector.broadcast %cst_16 : f32 to vector<2x1xf32>
    %73 = arith.divf %71, %72 : vector<2x1xf32>
    %74 = vector.broadcast %73 : vector<2x1xf32> to vector<2x16xf32>
    %75 = arith.subf %69, %74 : vector<2x16xf32>
    %76 = arith.mulf %75, %75 : vector<2x16xf32>
    %cst_17 = arith.constant dense<0.000000e+00> : vector<2xf32>
    %77 = vector.multi_reduction <add>, %76, %cst_17 [1] : vector<2x16xf32> to vector<2xf32>
    %78 = vector.shape_cast %77 : vector<2xf32> to vector<2x1xf32>
    %cst_18 = arith.constant 1.600000e+01 : f32
    %79 = vector.broadcast %cst_18 : f32 to vector<2x1xf32>
    %80 = arith.divf %78, %79 : vector<2x1xf32>
    %cst_19 = arith.constant 9.99999974E-6 : f32
    %81 = vector.broadcast %cst_19 : f32 to vector<2x1xf32>
    %82 = arith.addf %80, %81 : vector<2x1xf32>
    %83 = math.rsqrt %82 : vector<2x1xf32>
    %84 = vector.broadcast %83 : vector<2x1xf32> to vector<2x16xf32>
    %85 = arith.mulf %75, %84 : vector<2x16xf32>
    %86 = vector.broadcast %37 : vector<1x16xf32> to vector<2x16xf32>
    %87 = arith.mulf %85, %86 : vector<2x16xf32>
    %88 = vector.broadcast %38 : vector<1x16xf32> to vector<2x16xf32>
    %89 = arith.addf %87, %88 : vector<2x16xf32>
    %c64 = arith.constant 64 : index
    %c0_20 = arith.constant 0 : index
    %90 = vector.load %arg2[%c64, %c0_20] : memref<80x128xbf16, #tpu.memory_space<vmem>>, vector<16x128xbf16>
    %91 = arith.truncf %89 : vector<2x16xf32> to vector<2x16xbf16>
    %cst_21 = arith.constant dense<0.000000e+00> : vector<2x128xf32>
    %92 = tpu.matmul %91, %90, %cst_21 {dimension_numbers = #tpu.dot_dimension_numbers<[1], [0], [0], [1], [0, 0, 1, 1], [], []>} : vector<2x16xbf16>, vector<16x128xbf16>, vector<2x128xf32> -> vector<2x128xf32>
    %93 = vector.broadcast %39 : vector<1x128xf32> to vector<2x128xf32>
    %94 = arith.addf %92, %93 : vector<2x128xf32>
    %c0_22 = arith.constant 0 : index
    %c0_23 = arith.constant 0 : index
    %95 = vector.load %arg4[%c0_22, %c0_23] : memref<2x128xf32, #tpu.memory_space<vmem>>, vector<2x128xf32>
    tpu.vector_store %arg4[%c0_22, %c0_23], %94 {strides = array<i32>} : memref<2x128xf32, #tpu.memory_space<vmem>>, vector<2x128xf32>,
    return
  }
  func.func @transform_0(%arg0: i32) -> (i32, i32) {
    %c0_i32 = arith.constant 0 : i32
    %c0_i32_0 = arith.constant 0 : i32
    return %arg0, %c0_i32 : i32, i32
  }
  func.func @transform_1(%arg0: i32) -> (i32, i32) {
    %c0_i32 = arith.constant 0 : i32
    %c0_i32_0 = arith.constant 0 : i32
    %c0_i32_1 = arith.constant 0 : i32
    return %c0_i32, %c0_i32_0 : i32, i32
  }
  func.func @transform_2(%arg0: i32) -> (i32, i32) {
    %c0_i32 = arith.constant 0 : i32
    %c0_i32_0 = arith.constant 0 : i32
    %c0_i32_1 = arith.constant 0 : i32
    return %c0_i32, %c0_i32_0 : i32, i32
  }
  func.func @transform_3(%arg0: i32) -> (i32, i32) {
    %c0_i32 = arith.constant 0 : i32
    %c0_i32_0 = arith.constant 0 : i32
    return %arg0, %c0_i32 : i32, i32
  }
}

</mosaic_0001>

<bundles_post_ra>
// kernel: tpu_custom_call.1
= control target key start
LH: loop header
LB: loop body
LE: loop exit
PB: predicated region body
PF: predicated region fallthrough
CT: control target
= control target key end

     0   :  { %8 = vsyncpa [#allocation3], 0  ;;  %s803_s0 = inlined_call_operand.hbm [shape: bf16[32,32], index: 0, kind: input, shape index: {}]   ;;  %s804_s1 = inlined_call_operand.hbm [shape: bf16[80,128], index: 1, kind: input, shape index: {}]   ;;  %s805_s2 = inlined_call_operand.hbm [shape: f32[8,128], index: 2, kind: input, shape index: {}]   ;;  %s806_s3 = inlined_call_operand.hbm [shape: f32[2,128], index: 3, kind: output, shape index: {}]  }
   0x1   :  { %9 = vsyncpa [#allocation6], 0 }
   0x2   :  { %10 = vsyncpa [#allocation4], 0  ;;  %s654_s12 = smov [#allocation5]   ;;  %s655_s14 = smov [#allocation2]  }
   0x3   :  { %s28_s13 = sshll.u32 %s654_s12, 4  ;;  %s16_s15 = sshll.u32 %s655_s14, 4  ;;  %s29_s13 = int_to_ptr.vmem [resolvable:$true] %s28_s13  ;;  %s686_s15 = int_to_ptr.vmem [resolvable:$true] %s16_s15 }
   0x4   :  { %s560_s18 = scalar_lea.hbm %s804_s1, 640 }
   0x5   :  { %p561_p0 = scmp.ne.s32.totalorder %s804_s1, %s560_s18  ;;  %p564_p1 = scmp.lt.u32.totalorder %s560_s18, %s804_s1 }
   0x7   :  { %p566_p2 = pnand %p564_p1, %p561_p0 }
   0x9   :  { %569 = shalt.err (!%p566_p2)
}
   0xa   :  { %s570_s23 = scalar_lea.vmem %s29_s13, 640  ;;  %p575_p4 = scmp.lt.s32.totalorder %s29_s13, %s29_s13 }
   0xb   :  { %p571_p3 = scmp.ne.s32.totalorder %s29_s13, %s570_s23  ;;  %p576_p5 = scmp.lt.s32.totalorder %s570_s23, %s570_s23 }
   0xd   :  { %p577_p6 = por %p576_p5, %p575_p4 }
   0xf   :  { %p578_p7 = pnand %p577_p6, %p571_p3 }
  0x11   :  { %581 = shalt.err (!%p578_p7)
}
  0x12   :  { %s656_s24 = smov 64   ;;  %s657_s25 = smov 4  }
  0x13   :  { %34 = dma.hbm_to_vmem [thread:$0]  %s804_s1, 640, %s29_s13, [#allocation6], %s656_s24, %s656_s24, %s657_s25  }
  0x14   :  { %s582_s30 = scalar_lea.hbm %s803_s0, 256 }
  0x15   :  { %p583_p8 = scmp.ne.s32.totalorder %s803_s0, %s582_s30  ;;  %p586_p9 = scmp.lt.u32.totalorder %s582_s30, %s803_s0 }
  0x17   :  { %p588_p10 = pnand %p586_p9, %p583_p8 }
  0x19   :  { %591 = shalt.err (!%p588_p10)
}
  0x1a   :  { %s592_s8 = scalar_lea.vmem %s686_s15, 256  ;;  %p597_p12 = scmp.lt.s32.totalorder %s686_s15, %s686_s15 }
  0x1b   :  { %p593_p11 = scmp.ne.s32.totalorder %s686_s15, %s592_s8  ;;  %p598_p13 = scmp.lt.s32.totalorder %s592_s8, %s592_s8 }
  0x1d   :  { %p599_p0 = por %p598_p13, %p597_p12 }
  0x1f   :  { %p600_p1 = pnand %p599_p0, %p593_p11 }
  0x21   :  { %603 = shalt.err (!%p600_p1)
}
  0x22   :  { %22 = dma.hbm_to_vmem [thread:$0]  %s803_s0, 256, %s686_s15, [#allocation3], %s656_s24, %s656_s24, %s657_s25  }
  0x23   :  { %s658_s10 = smov [#allocation7]   ;;  %s604_s14 = scalar_lea.hbm %s805_s2, 128 }
  0x24   :  { %s41_s11 = sshll.u32 %s658_s10, 4  ;;  %p605_p2 = scmp.ne.s32.totalorder %s805_s2, %s604_s14  ;;  %s42_s11 = int_to_ptr.vmem [resolvable:$true] %s41_s11 }
  0x25   :  { %p608_p3 = scmp.lt.u32.totalorder %s604_s14, %s805_s2 }
  0x27   :  { %p610_p4 = pnand %p608_p3, %p605_p2 }
  0x29   :  { %613 = shalt.err (!%p610_p4)
}
  0x2a   :  { %s614_s20 = scalar_lea.vmem %s42_s11, 128  ;;  %p619_p6 = scmp.lt.s32.totalorder %s42_s11, %s42_s11 }
  0x2b   :  { %p615_p5 = scmp.ne.s32.totalorder %s42_s11, %s614_s20  ;;  %p620_p7 = scmp.lt.s32.totalorder %s614_s20, %s614_s20 }
  0x2d   :  { %p621_p8 = por %p620_p7, %p619_p6 }
  0x2f   :  { %p622_p9 = pnand %p621_p8, %p615_p5 }
  0x31   :  { %625 = shalt.err (!%p622_p9)
}
  0x32   :  { %44 = dma.hbm_to_vmem [thread:$0]  %s805_s2, 128, %s42_s11, [#allocation6]  }
  0x33   :  { %648 = dma.done.wait [#allocation3], 256  }
  0x34   :  { %649 = vsyncadd [#allocation3], 4294967040 }
  0x35   :  { %650 = dma.done.wait [#allocation6], 768  }
  0x36   :  { %651 = vsyncadd [#allocation6], 4294966528  ;;  %v549_v0 = vld [vmem:[#allocation5] sm:$0xff]   ;;  %v550_v1 = vld [vmem:[#allocation5 + $0x8] sm:$0xff]   ;;  %vm85_vm0 = vcmask 261120   ;;  %v145_v4 = vlaneseq  ;;  %s659_s2 = smov 80  }
  0x37   :  { %515 = vmatprep.subr.bf16.mxu0 %v549_v0  ;;  %v551_v2 = vld [vmem:[#allocation2] sm:$0xff]   ;;  %v552_v3 = vld [vmem:[#allocation2 + $0x8] sm:$0xff]   ;;  %s660_s21 = smov 104   ;;  %s661_s22 = smov 56   ;;  %v662_v40 = vmov 15   ;;  %vm247_vm7 = vcmask 195584  }
  0x38   :  { %516 = vmatpush3.bf16.msra.mxu0 %v549_v0  ;;  %519 = vmatprep.mubr.msk.bf16.mxu0 %vm85_vm0, %v551_v2  ;;  %v729_v5 = vshrl.u32 %v145_v4, 7  ;;  %v232_v36 = vand.u32 127, %v145_v4  ;;  %vm278_vm8 = vcmask 1041409   ;;  %vm281_vm9 = vcmask 189440   ;;  %s665_s23 = smov [#allocation8]  }
  0x39   :  { %517 = vmatprep.subr.bf16.mxu0 %v550_v1  ;;  %vm352_vm10 = vcmask 1043456   ;;  %vm664_vm11 = vmmov 0   ;;  %vm396_vm12 = vcmask 123904   ;;  %vm434_vm13 = vcmask 130048   ;;  %s485_s24 = sshll.u32 %s665_s23, 4  ;;  %s486_s24 = int_to_ptr.vmem [resolvable:$true] %s485_s24 }
  0x3a   :  { %vm176_vm1 = vcmp.lt.s32.totalorder %v729_v5, 6  ;;  %vm147_vm2 = vcmp.lt.s32.totalorder %v729_v5, 7  ;;  %vm205_vm3 = vcmp.lt.s32.totalorder %v729_v5, 5  ;;  %vm233_vm4 = vcmp.ge.s32.totalorder %v232_v36, 8  ;;  %s626_s25 = scalar_lea.vmem %s486_s24, 32  ;;  %p631_p11 = scmp.lt.s32.totalorder %s486_s24, %s486_s24 }
  0x3b   :  { %v234_v41 = vsel %vm233_vm4, 14, %v662_v40  ;;  %vm235_vm5 = vcmp.ge.s32.totalorder %v232_v36, 16  ;;  %v230_v44 = vadd.s32 8, %v729_v5  ;;  %v553_v40 = vld [vmem:[#allocation5 + $0x10] sm:$0xff]   ;;  %p627_p10 = scmp.ne.s32.totalorder %s486_s24, %s626_s25  ;;  %p632_p12 = scmp.lt.s32.totalorder %s626_s25, %s626_s25 }
  0x3c   :  { %518 = vmatpush3.bf16.msra.mxu0 %v550_v1  ;;  %v236_v45 = vsel %vm235_vm5, 13, %v234_v41  ;;  %v554_v41 = vld [vmem:[#allocation5 + $0x18] ss:$0 sps:$4 sm:$0xff]  }
  0x3d   :  { %vm238_vm6 = vcmp.lt.s32.totalorder %v230_v44, %v236_v45  ;;  %p633_p13 = por %p632_p12, %p631_p11 }
  0x3f   :  { %520 = vmatmul.mubr.msk.bf16.vlgmr.msra.gmra.mrb[0].mxu0 %vm85_vm0, %v552_v3  ;;  %p634_p0 = pnand %p633_p13, %p627_p10 }
 0x112   :  { %v521_v6 = vpop.f32.mrb[0].mxu0 }
 0x113   :  { %v731_v7 = vpop.f32.mrb[1].mxu0  ;;  %v143_v8 = vrot.slane %v521_v6, 1  ;;  %v174_v13 = vrot.slane %v521_v6, 2  ;;  %v203_v18 = vrot.slane %v521_v6, 3 }
 0x114   :  { %v201_v9 = vrot.slane %v731_v7, 3  ;;  %v522_v10 = vpop.f32.mrb[2].mxu0  ;;  %v172_v11 = vrot.slane %v731_v7, 2  ;;  %v141_v12 = vrot.slane %v731_v7, 1 }
 0x115   :  { %v204_v14 = vrot.slane %v522_v10, 3  ;;  %v129_v15 = vpop.f32.mrb[3].mxu0  ;;  %v175_v16 = vrot.slane %v522_v10, 2  ;;  %v144_v17 = vrot.slane %v522_v10, 1 }
 0x116   :  { %v142_v19 = vrot.slane %v129_v15, 1  ;;  %v173_v20 = vrot.slane %v129_v15, 2  ;;  %v202_v21 = vrot.slane %v129_v15, 3 }
 0x117   :  { %v180_v22 = vsel %vm176_vm1, %v175_v16, %v172_v11  ;;  %v151_v23 = vsel %vm147_vm2, %v144_v17, %v141_v12  ;;  %v177_v24 = vsel %vm176_vm1, %v174_v13, %v175_v16  ;;  %v148_v25 = vsel %vm147_vm2, %v143_v8, %v144_v17 }
 0x118   :  { %191 = vrot.lane.b32.xlu1 %v180_v22, %s659_s2  ;;  %162 = vrot.lane.b32.xlu0 %v151_v23, %s660_s21  ;;  %v209_v26 = vsel %vm205_vm3, %v204_v14, %v201_v9  ;;  %v150_v27 = vsel %vm147_vm2, %v141_v12, %v142_v19  ;;  %v178_v28 = vsel %vm176_vm1, %v173_v20, %v174_v13  ;;  %v772_v13 = vld [vmem:[#allocation7] sm:$0xff] }
 0x119   :  { %v149_v29 = vsel %vm147_vm2, %v142_v19, %v143_v8  ;;  %v179_v30 = vsel %vm176_vm1, %v172_v11, %v173_v20  ;;  %v206_v31 = vsel %vm205_vm3, %v203_v18, %v204_v14  ;;  %v207_v32 = vsel %vm205_vm3, %v202_v21, %v203_v18 }
 0x11a   :  { %v208_v33 = vsel %vm205_vm3, %v201_v9, %v202_v21  ;;  %v269_v11 = vsub.s32 0, %v729_v5 }
 0x11c   :  { %189 = vrot.lane.b32.xlu1 %v177_v24, %s659_s2  ;;  %160 = vrot.lane.b32.xlu0 %v148_v25, %s660_s21  ;;  %v270_v17 = vrot.slane %v772_v13, %v269_v11 }
 0x120   :  { %220 = vrot.lane.b32.xlu1 %v209_v26, %s661_s22  ;;  %156 = vrot.lane.b32.xlu0 %v150_v27, %s660_s21 }
 0x124   :  { %187 = vrot.lane.b32.xlu0 %v178_v28, %s659_s2  ;;  %158 = vrot.lane.b32.xlu1 %v149_v29, %s660_s21 }
 0x128   :  { %185 = vrot.lane.b32.xlu0 %v179_v30, %s659_s2  ;;  %218 = vrot.lane.b32.xlu1 %v206_v31, %s661_s22 }
 0x12c   :  { %216 = vrot.lane.b32.xlu0 %v207_v32, %s661_s22  ;;  %214 = vrot.lane.b32.xlu1 %v208_v33, %s661_s22 }
 0x18a   :  { %v192_v34 = vpop.permute.xlu1 %191  ;;  %v163_v35 = vpop.permute.xlu0 %162 }
 0x18b   :  { %v171_v39 = vadd.f32 %v522_v10, %v163_v35 }
 0x18d   :  { %v200_v46 = vadd.f32 %v192_v34, %v171_v39 }
 0x18e   :  { %v190_v37 = vpop.permute.xlu1 %189  ;;  %v161_v38 = vpop.permute.xlu0 %160 }
 0x18f   :  { %v170_v47 = vadd.f32 %v521_v6, %v161_v38 }
 0x191   :  { %v199_v52 = vadd.f32 %v190_v37, %v170_v47  ;;  %v314_v47 = vsub.s32 1, %v729_v5 }
 0x192   :  { %v221_v42 = vpop.permute.xlu1 %220  ;;  %v157_v43 = vpop.permute.xlu0 %156 }
 0x193   :  { %v229_v48 = vadd.f32 %v221_v42, %v200_v46  ;;  %v168_v56 = vadd.f32 %v157_v43, %v731_v7  ;;  %v663_v42 = vmov 0.0   ;;  %v354_v43 = vsel %vm352_vm10, %v554_v41, 0 }
 0x194   :  { %523 = vmatprep.subr.bf16.mxu1 %v663_v42  ;;  %527 = vmatprep.mubr.msk.bf16.mxu1 %vm664_vm11, %v663_v42 }
 0x195   :  { %v246_v53 = vsel %vm238_vm6, %v229_v48, -inf  ;;  %524 = vmatpush3.bf16.msra.mxu1 %v553_v40  ;;  %531 = vmatprep.subr.bf16.mxu0 %v663_v42  ;;  %v320_v48 = vsub.s32 2, %v729_v5 }
 0x196   :  { %v188_v49 = vpop.permute.xlu0 %187  ;;  %v159_v50 = vpop.permute.xlu1 %158  ;;  %v258_v58 = vsel %vm247_vm7, %v246_v53, -inf  ;;  %525 = vmatprep.subr.bf16.mxu1 %v663_v42  ;;  %533 = vmatprep.mubr.msk.bf16.mxu0 %vm664_vm11, %v663_v42 }
 0x197   :  { %v169_v51 = vadd.f32 %v159_v50, %v129_v15  ;;  %v321_v53 = vrot.slane %v772_v13, %v320_v48 }
 0x199   :  { %v198_v61 = vadd.f32 %v188_v49, %v169_v51  ;;  %526 = vmatpush3.bf16.msra.mxu1 %v354_v43  ;;  %v315_v49 = vrot.slane %v772_v13, %v314_v47 }
 0x19a   :  { %v186_v54 = vpop.permute.xlu0 %185  ;;  %v219_v55 = vpop.permute.xlu1 %218 }
 0x19b   :  { %v228_v57 = vadd.f32 %v219_v55, %v199_v52  ;;  %v197_v59 = vadd.f32 %v186_v54, %v168_v56 }
 0x19d   :  { %v257_v60 = vsel %vm247_vm7, %v228_v57, -inf }
 0x19e   :  { %v259_v62 = vmax.f32 %v257_v60, %v258_v58  ;;  %v217_v63 = vpop.permute.xlu0 %216  ;;  %v215_v0 = vpop.permute.xlu1 %214 }
 0x19f   :  { %v227_v1 = vadd.f32 %v217_v63, %v198_v61  ;;  %v226_v2 = vadd.f32 %v215_v0, %v197_v59 }
 0x1a0   :  { %v260_v3 = vrot.slane %v259_v62, 4 }
 0x1a1   :  { %v244_v4 = vsel %vm238_vm6, %v227_v1, -inf  ;;  %v248_v6 = vsel %vm247_vm7, %v226_v2, -inf  ;;  %v331_v2 = vsub.s32 3, %v729_v5 }
 0x1a2   :  { %v261_v8 = vmax.f32 %v259_v62, %v260_v3  ;;  %v249_v7 = vsel %vm247_vm7, %v244_v4, -inf }
 0x1a3   :  { %v250_v9 = vmax.f32 %v248_v6, %v249_v7  ;;  %v332_v3 = vrot.slane %v772_v13, %v331_v2 }
 0x1a4   :  { %v262_v10 = vrot.slane %v261_v8, 2 }
 0x1a5   :  { %v251_v12 = vrot.slane %v250_v9, 4 }
 0x1a6   :  { %v263_v14 = vmax.f32 %v261_v8, %v262_v10 }
 0x1a7   :  { %v252_v15 = vmax.f32 %v250_v9, %v251_v12 }
 0x1a8   :  { %v264_v16 = vrot.slane %v263_v14, 1 }
 0x1a9   :  { %v253_v18 = vrot.slane %v252_v15, 2 }
 0x1aa   :  { %v265_v19 = vmax.f32 %v263_v14, %v264_v16 }
 0x1ab   :  { %v254_v20 = vmax.f32 %v252_v15, %v253_v18 }
 0x1ac   :  { %v272_v21 = vadd.f32 %v270_v17, %v265_v19 }
 0x1ad   :  { %v255_v22 = vrot.slane %v254_v20, 1 }
 0x1ae   :  { %v274_v24 = vmax.f32 %v272_v21, 0.0  ;;  %v413_v21 = vsub.s32 4, %v729_v5 }
 0x1af   :  { %v256_v23 = vmax.f32 %v254_v20, %v255_v22  ;;  %v418_v22 = vsub.s32 5, %v729_v5 }
 0x1b0   :  { %v277_v27 = vrot.slane %v274_v24, 7 }
 0x1b1   :  { %v271_v25 = vadd.f32 %v270_v17, %v256_v23  ;;  %v555_v17 = vld [vmem:[#allocation5 + $0x20] sm:$0xff]   ;;  %v414_v23 = vrot.slane %v772_v13, %v413_v21 }
 0x1b2   :  { %532 = vmatpush3.bf16.msra.mxu0 %v555_v17 }
 0x1b3   :  { %v273_v26 = vmax.f32 %v271_v25, 0.0 }
 0x1b5   :  { %v279_v28 = vsel %vm278_vm8, %v277_v27, %v273_v26 }
 0x1b6   :  { %v282_v29 = vsel %vm281_vm9, %v279_v28, 0.0 }
 0x1b7   :  { %283 = vadd.xlane.f32.xlu0 %v282_v29 }
 0x244   :  { %v284_v30 = vpop.xlane.xlu0 %283 }
 0x245   :  { %v286_v31 = vmul.f32 0.041666668, %v284_v30  ;;  %v426_v30 = vsub.s32 6, %v729_v5 }
 0x247   :  { %v288_v32 = vrot.slane %v286_v31, 1  ;;  %v291_v33 = vsub.f32 %v273_v26, %v286_v31  ;;  %v419_v26 = vrot.slane %v772_v13, %v418_v22  ;;  %v427_v31 = vrot.slane %v772_v13, %v426_v30 }
 0x249   :  { %v292_v34 = vsub.f32 %v274_v24, %v288_v32  ;;  %v293_v36 = vmul.f32 %v291_v33, %v291_v33 }
 0x24b   :  { %v294_v35 = vmul.f32 %v292_v34, %v292_v34 }
 0x24d   :  { %v297_v37 = vrot.slane %v294_v35, 7 }
 0x24f   :  { %v298_v38 = vsel %vm278_vm8, %v297_v37, %v293_v36 }
 0x250   :  { %v300_v39 = vsel %vm281_vm9, %v298_v38, 0.0 }
 0x251   :  { %301 = vadd.xlane.f32.xlu1 %v300_v39 }
 0x2de   :  { %v302_v44 = vpop.xlane.xlu1 %301 }
 0x2df   :  { %v303_v45 = vmul.f32 0.041666668, %v302_v44 }
 0x2e1   :  { %v304_v46 = vadd.f32 1e-05, %v303_v45 }
 0x2e3   :  { %556 = vrsqrt.f32 %v304_v46 }
 0x2ed   :  { %v557_v50 = vpop.eup %556 }
 0x2ee   :  { %v307_v51 = vrot.slane %v557_v50, 1  ;;  %v310_v52 = vmul.f32 %v557_v50, %v291_v33 }
 0x2f0   :  { %v311_v54 = vmul.f32 %v307_v51, %v292_v34  ;;  %v316_v55 = vmul.f32 %v315_v49, %v310_v52 }
 0x2f2   :  { %v317_v56 = vmul.f32 %v315_v49, %v311_v54  ;;  %v322_v57 = vadd.f32 %v321_v53, %v316_v55 }
 0x2f4   :  { %v323_v58 = vadd.f32 %v321_v53, %v317_v56  ;;  %v327_v59 = vpack.c.bf16 %v322_v57, %v322_v57 }
 0x2f6   :  { %v328_v60 = vpack.c.bf16 %v323_v58, %v323_v58  ;;  %v335_v62 = vunpack.c.l.b16 %v327_v59 }
 0x2f8   :  { %v336_v61 = vunpack.c.l.b16 %v328_v60 }
 0x2fa   :  { %v337_v63 = vrot.slane %v336_v61, 7 }
 0x2fc   :  { %v338_v0 = vsel %vm278_vm8, %v337_v63, %v335_v62 }
 0x2fd   :  { %v339_v1 = vpack.c.b16 %v338_v0, %v338_v0 }
 0x2ff   :  { %528 = vmatmul.mubr.msk.bf16.vlgmr.msra.gmra.mrb[0].mxu1 %vm247_vm7, %v339_v1 }
 0x3d2   :  { %v390_v4 = vpop.f32.mrb[0].mxu1 }
 0x3d3   :  { %v391_v6 = vadd.f32 %v390_v4, %v332_v3  ;;  %v529_v8 = vpop.f32.mrb[1].mxu1 }
 0x3d4   :  { %v393_v7 = vpop.f32.mrb[2].mxu1 }
 0x3d5   :  { %v530_v9 = vpop.f32.mrb[3].mxu1  ;;  %v397_v10 = vsel %vm396_vm12, %v391_v6, 0.0 }
 0x3d6   :  { %398 = vadd.xlane.f32.xlu0 %v397_v10 }
 0x463   :  { %v399_v11 = vpop.xlane.xlu0 %398 }
 0x464   :  { %v401_v12 = vmul.f32 0.0625, %v399_v11 }
 0x466   :  { %v402_v14 = vsub.f32 %v391_v6, %v401_v12 }
 0x468   :  { %v403_v15 = vmul.f32 %v402_v14, %v402_v14 }
 0x46a   :  { %v404_v16 = vsel %vm396_vm12, %v403_v15, 0.0 }
 0x46b   :  { %405 = vadd.xlane.f32.xlu0 %v404_v16 }
 0x4f8   :  { %v406_v18 = vpop.xlane.xlu0 %405 }
 0x4f9   :  { %v407_v19 = vmul.f32 0.0625, %v406_v18 }
 0x4fb   :  { %v408_v20 = vadd.f32 1e-05, %v407_v19 }
 0x4fd   :  { %558 = vrsqrt.f32 %v408_v20 }
 0x507   :  { %v559_v24 = vpop.eup %558 }
 0x508   :  { %v410_v25 = vmul.f32 %v559_v24, %v402_v14 }
 0x50a   :  { %v415_v27 = vmul.f32 %v414_v23, %v410_v25 }
 0x50c   :  { %v420_v28 = vadd.f32 %v419_v26, %v415_v27 }
 0x50e   :  { %v423_v29 = vpack.c.bf16 %v420_v28, %v420_v28 }
 0x510   :  { %534 = vmatmul.mubr.msk.bf16.vlgmr.msra.gmra.mrb[4].mxu0 %vm434_vm13, %v423_v29 }
 0x5e3   :  { %v472_v32 = vpop.f32.mrb[4].mxu0 }
 0x5e4   :  { %v473_v33 = vadd.f32 %v472_v32, %v427_v31  ;;  %v535_v34 = vpop.f32.mrb[5].mxu0 }
 0x5e5   :  { %v475_v35 = vpop.f32.mrb[6].mxu0 }
 0x5e6   :  { %478 = vst [vmem:[#allocation8] sm:$0x3] %v473_v33  ;;  %v536_v36 = vpop.f32.mrb[7].mxu0 }
 0x5e7   :  { %637 = shalt.err (!%p634_p0)
}
 0x5e8   :  { %s638_s28 = scalar_lea.hbm %s806_s3, 32 }
 0x5e9   :  { %p639_p1 = scmp.ne.s32.totalorder %s806_s3, %s638_s28  ;;  %p642_p2 = scmp.lt.u32.totalorder %s638_s28, %s806_s3 }
 0x5eb   :  { %p644_p3 = pnand %p642_p2, %p639_p1 }
 0x5ed   :  { %647 = shalt.err (!%p644_p3)
}
 0x5ee   :  { %488 = dma.vmem_to_hbm [thread:$0]  %s486_s24, 32, %s806_s3, [#allocation4]  }
 0x5ef   :  { %652 = dma.done.wait [#allocation4], 32  }
 0x5f0   :  { %653 = vsyncadd [#allocation4], 4294967264 }
 0x5f1   :  { %492 = vsyncpa [#allocation3], 1 }
 0x5f2   :  { %493 = vsyncpa [#allocation6], 1 }
 0x5f3   :  { %494 = vsyncpa [#allocation4], 1 }

</bundles_post_ra>
